<compile_context>
chip_gen: v5e
topology: v5e:2x2
jax: 0.10.0
libtpu: 0.0.40
codegen_flags: <defaults>
</compile_context>

<pallas_src>
import functools
import math

import jax
import jax.numpy as jnp
from jax import lax
from jax.experimental import pallas as pl
from jax.experimental.pallas import tpu as pltpu


def _round_up(v, m):
    return (v + m - 1) // m * m


# ------------------------------- Pallas kernel -------------------------------

def _attblock_kernel(x_ref, w_ref, b_ref, clip_ref, att_ref, cla_ref,
                     *, n_pad, t_valid, t_pad, sigmoid_act):
    """Fused AttBlockV2 for one batch element.

    x_ref   : (1, C_pad, T_pad)   bf16  input slab (zero padded)
    w_ref   : (2*n_pad, C_pad)    bf16  [W_att ; W_cla] fused, zero padded
    b_ref   : (2*n_pad, 1)        f32   [b_att ; b_cla] fused
    clip_ref: (1, 1, n_pad)       f32   clipwise output (padded)
    att_ref : (1, n_pad, T_pad)   f32   norm_att output (lane-dense time axis)
    cla_ref : (1, n_pad, T_pad)   f32   cla output      (lane-dense time axis)
    """
    x = x_ref[0]                      # (C_pad, T_pad) bf16
    w = w_ref[...]                    # (2*n_pad, C_pad) bf16

    # One MXU pass computes both 1x1 convs; accumulate in f32.
    y = jnp.dot(w, x, preferred_element_type=jnp.float32) + b_ref[...]

    att_logit = y[:n_pad, :]          # split at an 8-row (f32 tile) boundary
    cla_raw = y[n_pad:, :]

    # softmax over time.  tanh is bounded in [-1, 1] -> exp is always safe, so
    # the usual max-subtraction stabilisation pass is unnecessary.
    e = jnp.exp(jnp.tanh(att_logit))                      # EUP
    if t_valid != t_pad:
        # zero attention weight on padded time columns
        col = lax.broadcasted_iota(jnp.int32, e.shape, 1)
        e = jnp.where(col < t_valid, e, 0.0)
    inv_den = pl.reciprocal(jnp.sum(e, axis=-1, keepdims=True), approx=True)
    norm_att = e * inv_den

    cla = jax.nn.sigmoid(cla_raw) if sigmoid_act else cla_raw

    # padded time columns contribute 0 (norm_att is 0 there)
    clip = jnp.sum(norm_att * cla, axis=-1)               # (n_pad,)

    clip_ref[...] = clip[None, None, :].astype(clip_ref.dtype)
    att_ref[0] = norm_att.astype(att_ref.dtype)
    cla_ref[0] = cla.astype(cla_ref.dtype)


# --------------------------------- wrapper -----------------------------------

def att_block_v2(x, w_att, b_att, w_cla, b_cla, activation="linear"):
    """Pallas AttBlockV2 forward.

    x     : (B, in_features, T) float
    w_att : (out_features, in_features)   (torch Conv1d k=1 weight, squeezed)
    b_att : (out_features,)
    w_cla : (out_features, in_features)
    b_cla : (out_features,)
    returns (clipwise (B, out_f), norm_att (B, out_f, T), cla (B, out_f, T))
    """
    B, C, T = x.shape
    n_out = w_att.shape[0]
    n_pad = _round_up(max(n_out, 1), 8)      # sublane-aligned class rows (f32 tile)
    c_pad = _round_up(C, 128)                # aligned reduction dim
    t_pad = _round_up(T, 128)                # lane-dense time dim

    # Fused, zero-padded weights / bias. MXU operands in bf16, f32 accumulation.
    w = jnp.zeros((2 * n_pad, c_pad), jnp.float32)
    w = w.at[:n_out, :C].set(w_att.astype(jnp.float32))
    w = w.at[n_pad:n_pad + n_out, :C].set(w_cla.astype(jnp.float32))
    w = w.astype(jnp.bfloat16)

    b = jnp.zeros((2 * n_pad, 1), jnp.float32)
    b = b.at[:n_out, 0].set(b_att.astype(jnp.float32))
    b = b.at[n_pad:n_pad + n_out, 0].set(b_cla.astype(jnp.float32))

    xp = jnp.zeros((B, c_pad, t_pad), jnp.bfloat16)
    xp = xp.at[:, :C, :T].set(x.astype(jnp.bfloat16))

    kernel = functools.partial(_attblock_kernel, n_pad=n_pad, t_valid=T,
                               t_pad=t_pad,
                               sigmoid_act=(activation == "sigmoid"))

    # TODO(synk): for very long sequences (c_pad * t_pad slab approaching VMEM)
    # the softmax over time would need an online (flash-style) two-pass tiling
    # over T; model13 sequence lengths fit a single full-T block comfortably.
    clip, att, cla = pl.pallas_call(
        kernel,
        out_shape=(jax.ShapeDtypeStruct((B, 1, n_pad), jnp.float32),
                   jax.ShapeDtypeStruct((B, n_pad, t_pad), jnp.float32),
                   jax.ShapeDtypeStruct((B, n_pad, t_pad), jnp.float32)),
        grid_spec=pltpu.PrefetchScalarGridSpec(
            num_scalar_prefetch=0,
            grid=(B,),
            in_specs=[
                pl.BlockSpec((1, c_pad, t_pad), lambda i: (i, 0, 0)),
                pl.BlockSpec((2 * n_pad, c_pad), lambda i: (0, 0)),   # resident
                pl.BlockSpec((2 * n_pad, 1), lambda i: (0, 0)),       # resident
            ],
            out_specs=(
                pl.BlockSpec((1, 1, n_pad), lambda i: (i, 0, 0)),
                pl.BlockSpec((1, n_pad, t_pad), lambda i: (i, 0, 0)),
                pl.BlockSpec((1, n_pad, t_pad), lambda i: (i, 0, 0)),
            )),
        compiler_params=pltpu.CompilerParams(
            dimension_semantics=("parallel",)),
    )(xp, w, b)

    return (clip[:, 0, :n_out],
            att[:, :n_out, :T],
            cla[:, :n_out, :T])


# ------------------------------ pure-JAX reference ---------------------------

def att_block_v2_ref(x, w_att, b_att, w_cla, b_cla, activation="linear"):
    att = jnp.einsum("oc,bct->bot", w_att, x) + b_att[None, :, None]
    cla = jnp.einsum("oc,bct->bot", w_cla, x) + b_cla[None, :, None]
    norm_att = jax.nn.softmax(jnp.tanh(att), axis=-1)
    if activation == "sigmoid":
        cla = jax.nn.sigmoid(cla)
    clip = jnp.sum(norm_att * cla, axis=-1)
    return clip, norm_att, cla


# ------------------------------------ main -----------------------------------

if __name__ == "__main__":
    B, C, N_OUT, T = 3, 96, 6, 50    # deliberately unaligned to exercise padding
    key = jax.random.PRNGKey(0)
    k1, k2, k3, k4, k5 = jax.random.split(key, 5)

    bound = math.sqrt(6.0 / (C + N_OUT))     # xavier_uniform for 1x1 Conv1d
    w_att = jax.random.uniform(k1, (N_OUT, C), jnp.float32, -bound, bound)
    w_cla = jax.random.uniform(k2, (N_OUT, C), jnp.float32, -bound, bound)
    # init_layer() zeroes the bias; use small random biases here to exercise the
    # bias path (reference uses the same values, so semantics still match).
    b_att = 0.1 * jax.random.normal(k3, (N_OUT,), jnp.float32)
    b_cla = 0.1 * jax.random.normal(k4, (N_OUT,), jnp.float32)
    x = jax.random.normal(k5, (B, C, T), jnp.float32)

    for act in ("linear", "sigmoid"):
        fwd = jax.jit(functools.partial(att_block_v2, activation=act))
        clip, natt, cla = jax.block_until_ready(
            fwd(x, w_att, b_att, w_cla, b_cla))

        assert clip.shape == (B, N_OUT)
        assert natt.shape == (B, N_OUT, T)
        assert cla.shape == (B, N_OUT, T)

        rclip, rnatt, rcla = att_block_v2_ref(x, w_att, b_att, w_cla, b_cla, act)

        assert bool(jnp.all(jnp.isfinite(clip)))
        assert bool(jnp.all(jnp.isfinite(natt)))
        assert bool(jnp.all(jnp.isfinite(cla)))
        # bf16 MXU operands with f32 accumulation -> small drift vs f32 reference
        assert bool(jnp.allclose(clip, rclip, rtol=2e-2, atol=2e-2)), act
        assert bool(jnp.allclose(natt, rnatt, rtol=2e-2, atol=2e-2)), act
        assert bool(jnp.allclose(cla, rcla, rtol=2e-2, atol=2e-2)), act

    print("KERNEL_OK")
</pallas_src>

<mosaic_0001>
module attributes {stable_mosaic.version = 11 : i64} {
  func.func @_attblock_kernel(%arg0: i32, %arg1: memref<1x128x128xbf16, #tpu.memory_space<vmem>>, %arg2: memref<16x128xbf16, #tpu.memory_space<vmem>>, %arg3: memref<16x1xf32, #tpu.memory_space<vmem>>, %arg4: memref<1x1x8xf32, #tpu.memory_space<vmem>>, %arg5: memref<1x8x128xf32, #tpu.memory_space<vmem>>, %arg6: memref<1x8x128xf32, #tpu.memory_space<vmem>>) attributes {dimension_semantics = [#tpu.dimension_semantics<parallel>], iteration_bounds = array<i64: 3>, scalar_prefetch = 0 : i64, scratch_operands = 0 : i64, tpu.core_type = #tpu.core_type<tc>, window_params = [{transform_indices = @transform_0, window_bounds = array<i64: 1, 128, 128>}, {pipeline_mode = #tpu.pipeline_mode<synchronous>, transform_indices = @transform_1, window_bounds = array<i64: 16, 128>}, {pipeline_mode = #tpu.pipeline_mode<synchronous>, transform_indices = @transform_2, window_bounds = array<i64: 16, 1>}, {transform_indices = @transform_3, window_bounds = array<i64: 1, 1, 8>}, {transform_indices = @transform_4, window_bounds = array<i64: 1, 8, 128>}, {transform_indices = @transform_5, window_bounds = array<i64: 1, 8, 128>}]} {
    %c0 = arith.constant 0 : index
    %c0_0 = arith.constant 0 : index
    %c0_1 = arith.constant 0 : index
    %0 = vector.load %arg1[%c0, %c0_0, %c0_1] : memref<1x128x128xbf16, #tpu.memory_space<vmem>>, vector<1x128x128xbf16>
    %1 = vector.shape_cast %0 : vector<1x128x128xbf16> to vector<128x128xbf16>
    %c0_2 = arith.constant 0 : index
    %c0_3 = arith.constant 0 : index
    %2 = vector.load %arg2[%c0_2, %c0_3] : memref<16x128xbf16, #tpu.memory_space<vmem>>, vector<16x128xbf16>
    %cst = arith.constant dense<0.000000e+00> : vector<16x128xf32>
    %3 = tpu.matmul %2, %1, %cst {dimension_numbers = #tpu.dot_dimension_numbers<[1], [0], [0], [1], [0, 0, 1, 1], [], []>} : vector<16x128xbf16>, vector<128x128xbf16>, vector<16x128xf32> -> vector<16x128xf32>
    %c0_4 = arith.constant 0 : index
    %c0_5 = arith.constant 0 : index
    %4 = vector.load %arg3[%c0_4, %c0_5] : memref<16x1xf32, #tpu.memory_space<vmem>>, vector<16x1xf32>
    %5 = vector.broadcast %4 : vector<16x1xf32> to vector<16x128xf32>
    %6 = arith.addf %3, %5 : vector<16x128xf32>
    %7 = vector.extract_strided_slice %6 {offsets = [0, 0], sizes = [8, 128], strides = [1, 1]} : vector<16x128xf32> to vector<8x128xf32>
    %8 = vector.extract_strided_slice %6 {offsets = [8, 0], sizes = [8, 128], strides = [1, 1]} : vector<16x128xf32> to vector<8x128xf32>
    %9 = math.tanh %7 : vector<8x128xf32>
    %10 = math.exp %9 : vector<8x128xf32>
    %11 = tpu.iota {dimensions = array<i32: 1>} : vector<8x128xi32>
    %c50_i32 = arith.constant 50 : i32
    %12 = vector.broadcast %c50_i32 : i32 to vector<8x128xi32>
    %13 = arith.cmpi slt, %11, %12 : vector<8x128xi32>
    %cst_6 = arith.constant 0.000000e+00 : f32
    %14 = vector.broadcast %cst_6 : f32 to vector<8x128xf32>
    %15 = arith.select %13, %10, %14 : vector<8x128xi1>, vector<8x128xf32>
    %cst_7 = arith.constant dense<0.000000e+00> : vector<8xf32>
    %16 = vector.multi_reduction <add>, %15, %cst_7 [1] : vector<8x128xf32> to vector<8xf32>
    %17 = vector.shape_cast %16 : vector<8xf32> to vector<8x1xf32>
    %18 = tpu.reciprocal %17 {approx = true} : vector<8x1xf32> -> vector<8x1xf32>
    %19 = vector.broadcast %18 : vector<8x1xf32> to vector<8x128xf32>
    %20 = arith.mulf %15, %19 : vector<8x128xf32>
    %21 = arith.mulf %20, %8 : vector<8x128xf32>
    %cst_8 = arith.constant dense<0.000000e+00> : vector<8xf32>
    %22 = vector.multi_reduction <add>, %21, %cst_8 [1] : vector<8x128xf32> to vector<8xf32>
    %23 = vector.shape_cast %22 : vector<8xf32> to vector<1x1x8xf32>
    %c0_9 = arith.constant 0 : index
    %c0_10 = arith.constant 0 : index
    %c0_11 = arith.constant 0 : index
    %24 = vector.load %arg4[%c0_9, %c0_10, %c0_11] : memref<1x1x8xf32, #tpu.memory_space<vmem>>, vector<1x1x8xf32>
    tpu.vector_store %arg4[%c0_9, %c0_10, %c0_11], %23 {strides = array<i32>} : memref<1x1x8xf32, #tpu.memory_space<vmem>>, vector<1x1x8xf32>,
    %c0_12 = arith.constant 0 : index
    %c0_13 = arith.constant 0 : index
    %c0_14 = arith.constant 0 : index
    %25 = vector.load %arg5[%c0_12, %c0_13, %c0_14] : memref<1x8x128xf32, #tpu.memory_space<vmem>>, vector<1x8x128xf32>
    %26 = vector.shape_cast %25 : vector<1x8x128xf32> to vector<8x128xf32>
    %27 = vector.shape_cast %20 : vector<8x128xf32> to vector<1x8x128xf32>
    tpu.vector_store %arg5[%c0_12, %c0_13, %c0_14], %27 {strides = array<i32>} : memref<1x8x128xf32, #tpu.memory_space<vmem>>, vector<1x8x128xf32>,
    %c0_15 = arith.constant 0 : index
    %c0_16 = arith.constant 0 : index
    %c0_17 = arith.constant 0 : index
    %28 = vector.load %arg6[%c0_15, %c0_16, %c0_17] : memref<1x8x128xf32, #tpu.memory_space<vmem>>, vector<1x8x128xf32>
    %29 = vector.shape_cast %28 : vector<1x8x128xf32> to vector<8x128xf32>
    %30 = vector.shape_cast %8 : vector<8x128xf32> to vector<1x8x128xf32>
    tpu.vector_store %arg6[%c0_15, %c0_16, %c0_17], %30 {strides = array<i32>} : memref<1x8x128xf32, #tpu.memory_space<vmem>>, vector<1x8x128xf32>,
    return
  }
  func.func @transform_0(%arg0: i32) -> (i32, i32, i32) {
    %c0_i32 = arith.constant 0 : i32
    %c0_i32_0 = arith.constant 0 : i32
    %c0_i32_1 = arith.constant 0 : i32
    return %arg0, %c0_i32, %c0_i32_0 : i32, i32, i32
  }
  func.func @transform_1(%arg0: i32) -> (i32, i32) {
    %c0_i32 = arith.constant 0 : i32
    %c0_i32_0 = arith.constant 0 : i32
    %c0_i32_1 = arith.constant 0 : i32
    return %c0_i32, %c0_i32_0 : i32, i32
  }
  func.func @transform_2(%arg0: i32) -> (i32, i32) {
    %c0_i32 = arith.constant 0 : i32
    %c0_i32_0 = arith.constant 0 : i32
    %c0_i32_1 = arith.constant 0 : i32
    return %c0_i32, %c0_i32_0 : i32, i32
  }
  func.func @transform_3(%arg0: i32) -> (i32, i32, i32) {
    %c0_i32 = arith.constant 0 : i32
    %c0_i32_0 = arith.constant 0 : i32
    %c0_i32_1 = arith.constant 0 : i32
    return %arg0, %c0_i32, %c0_i32_0 : i32, i32, i32
  }
  func.func @transform_4(%arg0: i32) -> (i32, i32, i32) {
    %c0_i32 = arith.constant 0 : i32
    %c0_i32_0 = arith.constant 0 : i32
    %c0_i32_1 = arith.constant 0 : i32
    return %arg0, %c0_i32, %c0_i32_0 : i32, i32, i32
  }
  func.func @transform_5(%arg0: i32) -> (i32, i32, i32) {
    %c0_i32 = arith.constant 0 : i32
    %c0_i32_0 = arith.constant 0 : i32
    %c0_i32_1 = arith.constant 0 : i32
    return %arg0, %c0_i32, %c0_i32_0 : i32, i32, i32
  }
}

</mosaic_0001>

<bundles_post_ra>
// kernel: att_block_v2.1
= control target key start
LH: loop header
LB: loop body
LE: loop exit
PB: predicated region body
PF: predicated region fallthrough
CT: control target
= control target key end

     0   :  { %s872_s0 = inlined_call_operand.vmem [shape: bf16[3,128,128], index: 0, kind: input, shape index: {}]   ;;  %s873_s1 = inlined_call_operand.vmem [shape: bf16[16,128], index: 1, kind: input, shape index: {}]   ;;  %s874_s2 = inlined_call_operand.vmem [shape: f32[16,1], index: 2, kind: input, shape index: {}]   ;;  %s875_s3 = inlined_call_operand.vmem [shape: f32[3,1,8], index: 3, kind: output, shape index: {0}]   ;;  %s876_s4 = inlined_call_operand.hbm [shape: f32[3,8,128], index: 4, kind: output, shape index: {1}]   ;;  %s877_s5 = inlined_call_operand.hbm [shape: f32[3,8,128], index: 5, kind: output, shape index: {2}]  }
   0x1   :  { %878 = sst [smem:[#allocation8_spill]] %s872_s0 }
   0x2   :  { %879 = sst [smem:[#allocation9_spill]] %s873_s1 }
   0x3   :  { %11 = vsyncpa [#allocation3], 0 }
   0x4   :  { %13 = vsyncpa [#allocation3 + $0x1], 0 }
   0x5   :  { %14 = vsyncpa [#allocation5], 0 }
   0x6   :  { %16 = vsyncpa [#allocation5 + $0x1], 0  ;;  %s753_s18 = smov 0   ;;  %s755_s19 = smov 0  }
   0x7   :  { %s757_s20 = smov 0   ;;  %s759_s21 = smov 0  }
   0x8 LB: > { %s774_s22 = sadd.s32 4294967295, %s720_s21   ;;  %s513_s23 = sadd.s32 4294967294, %s720_s21   ;;  %s720_s21 = sphi %s759_s21, %s887_s21   ;;  %s716_s20 = sphi %s757_s20, %s886_s20   ;;  %s712_s19 = sphi %s755_s19, %s885_s19   ;;  %s708_s18 = sphi %s753_s18, %s884_s18  }
   0x9   : > { %s778_s24 = sadd.s32 1, %s720_s21   ;;  %s123_s25 = sadd.s32 1, %s716_s20 }
   0xa   : > { %s120_s26 = ssub.s32 %s720_s21, %s778_s24  ;;  %p133_p0 = scmp.ne.s32.totalorder %s716_s20, %s712_s19 }
   0xb   : > { %p121_p1 = scmp.eq.s32.totalorder %s120_s26, 0  ;;  %p134_p2 = scmp.eq.s32.totalorder %s774_s22, 2 }
   0xc   : > { %p139_p3 = scmp.ne.s32.totalorder %s712_s19, %s708_s18  ;;  %p140_p4 = scmp.eq.s32.totalorder %s513_s23, 2 }
   0xd   : > { %s789_s27 = scalar_select %p121_p1, %s716_s20, %s123_s25  }
   0xe   : > { %p791_p5 = por %p134_p2, %p133_p0  ;;  %p795_p6 = por %p140_p4, %p139_p3 }
   0xf   : > { %p516_p7 = scmp.ge.s32.totalorder %s720_s21, 1  ;;  %p198_p8 = scmp.lt.s32.totalorder %s720_s21, 4 }
  0x11   : > { %p199_p9 = pnand %p516_p7, %p198_p8 }
  0x12   : > { %p234_p10 = scmp.lt.s32.totalorder (!%p199_p9), %s774_s22, 2  ;;  %s882_s0 = sld [smem:[#allocation8_spill]] (!%p199_p9) }
  0x13   : > { %202 = sbr.rel (%p199_p9) target bundleno = 454 (0x1c6), region = 32  ;;  %s883_s1 = sld [smem:[#allocation9_spill]] (!%p199_p9) }
  0x14   : > { %s819_s16 = sand.u32 (!%p199_p9), 1, %s712_s19   ;;  %s559_s25 = sshll.u32 (!%p199_p9), %s774_s22, 3 }
  0x15   : > { %s517_s17 = sshll.u32 (!%p199_p9), %s819_s16, 3  ;;  %s383_s7 = scalar_lea.hbm (!%p199_p9), %s876_s4, %s559_s25 }
  0x16   : > { %s233_s23 = scalar_lea.vmem (!%p199_p9), [#allocation4], %s517_s17  ;;  %s397_s10 = scalar_lea.hbm (!%p199_p9), %s877_s5, %s559_s25 }
  0x17   : > { %s226_s11 = scalar_lea.vmem (!%p199_p9), [#allocation2], %s517_s17  ;;  %s387_s13 = sshll.u32 (!%p199_p9), %s383_s7, 4  ;;  %s388_s13 = int_to_ptr.hbm [resolvable:$true] %s387_s13 }
  0x18   : > { %s803_s30 = scalar_select %p234_p10, %s774_s22, 2  ;;  %v722_v2 = vmov 0   ;;  %v260_v3 = vld [vmem:[%s874_s2] sm:$0xff]  ;;  %v261_v4 = vld [vmem:[%s874_s2 + $0x8] sm:$0xff]  ;;  %v343_v17 = vlaneseq }
  0x19   : > { %618 = vset.pattern.permute.xlu0 %v722_v2  ;;  %619 = vset.pattern.permute.xlu1 %v722_v2  ;;  %v572_v11 = vld [vmem:[%s883_s1] sm:$0xff]  ;;  %s385_s12 = sshll.u32 %s226_s11, 4  ;;  %s399_s14 = sshll.u32 %s233_s23, 4  ;;  %s400_s14 = int_to_ptr.vmem [resolvable:$true] %s399_s14  ;;  %s386_s12 = int_to_ptr.vmem [resolvable:$true] %s385_s12 }
  0x1a   : > { %s563_s6 = sshll.u32 %s803_s30, 6  ;;  %264 = vperm.xlu0 %618, %v260_v3   ;;  %269 = vperm.xlu1 %619, %v261_v4   ;;  %v344_v21 = vand.u32 127, %v343_v17  ;;  %s401_s15 = sshll.u32 %s397_s10, 4  ;;  %s402_s15 = int_to_ptr.hbm [resolvable:$true] %s401_s15 }
  0x1b   : > { %s238_s9 = scalar_lea.vmem %s882_s0, %s563_s6  ;;  %s370_s0 = scalar_lea.sflag [#allocation5], %s819_s16 }
  0x1c   : > { %v571_v0 = vld [vmem:[%s238_s9 + $0x38] sm:$0xff]  ;;  %v570_v1 = vld [vmem:[%s238_s9 + $0x30] sm:$0xff]  ;;  %v569_v5 = vld [vmem:[%s238_s9 + $0x28] sm:$0xff]  ;;  %vm345_vm0 = vcmp.lt.s32.totalorder %v344_v21, 50  ;;  %s640_s22 = sshra.s32 %s402_s15, 4  ;;  %s646_s25 = scalar_lea.hbm %s877_s5, 24  ;;  %s641_s22 = int_to_ptr.hbm [resolvable:$true] %s640_s22 }
  0x1d   : > { %326 = vmatpush.bf16.msra.mxu0 %v571_v0  ;;  %v568_v6 = vld [vmem:[%s238_s9 + $0x20] sm:$0xff]  ;;  %v567_v7 = vld [vmem:[%s238_s9 + $0x18] sm:$0xff]  ;;  %v566_v8 = vld [vmem:[%s238_s9 + $0x10] sm:$0xff]  ;;  %s642_s1 = scalar_lea.hbm %s641_s22, 8  ;;  %p647_p0 = scmp.lt.s32.totalorder %s641_s22, %s877_s5 }
  0x1e   : > { %v565_v9 = vld [vmem:[%s238_s9 + $0x8] sm:$0xff]  ;;  %v564_v10 = vld [vmem:[%s238_s9] sm:$0xff]  ;;  %p643_p11 = scmp.ne.s32.totalorder %s641_s22, %s642_s1  ;;  %p648_p1 = scmp.lt.s32.totalorder %s646_s25, %s642_s1 }
  0x20   : > { %p644_p12 = pnand %p643_p11, %p791_p5  ;;  %p649_p2 = por %p648_p1, %p647_p0 }
  0x21   : > { %327 = vmatpush.bf16.msra.mxu0 %v570_v1 }
  0x22   : > { %p645_p13 = pneg %p644_p12 }
  0x24   : > { %p650_p3 = pnand %p649_p2, %p645_p13 }
  0x25   : > { %328 = vmatpush.bf16.msra.mxu0 %v569_v5 }
  0x29   : > { %329 = vmatpush.bf16.msra.mxu0 %v568_v6 }
  0x2d   : > { %330 = vmatpush.bf16.msra.mxu0 %v567_v7 }
  0x31   : > { %331 = vmatpush.bf16.msra.mxu0 %v566_v8 }
  0x35   : > { %332 = vmatpush.bf16.msra.mxu0 %v565_v9 }
  0x39   : > { %333 = vmatpush.bf16.msra.mxu0 %v564_v10 }
  0x3c   : > { %334 = vmatmul.bf16.vlgmr.msra.gmra.mxu0 %v572_v11 }
  0x8c   : > { %v265_v12 = vpop.permute.xlu0 %264  ;;  %v270_v15 = vpop.permute.xlu1 %269 }
  0xb9   : > { %v335_v13 = vpop.f32.mrf.mxu0 }
  0xba   : > { %v336_v14 = vadd.f32 %v335_v13, %v265_v12 }
  0xbc   : > { %620 = vtanh.f32 %v336_v14 }
  0xc1   : > { %v337_v16 = vpop.f32.mrf.mxu0 }
  0xc2   : > { %v621_v18 = vpop.eup %620  ;;  %v338_v19 = vadd.f32 %v337_v16, %v270_v15 }
  0xc3   : > { %v341_v20 = vmul.f32 1.442695, %v621_v18 }
  0xc4   : > { %360 = vst [vmem:[%s233_s23] sm:$0xff] %v338_v19 }
  0xc5   : > { %622 = vpow2.f32 %v341_v20 }
  0xcb   : > { %v623_v22 = vpop.eup %622 }
  0xcc   : > { %v346_v23 = vsel %vm345_vm0, %v623_v22, 0.0 }
  0xcd   : > { %347 = vadd.xlane.f32.xlu0 %v346_v23 }
 0x140   : > { %v348_v24 = vpop.xlane.xlu0 %347 }
 0x141   : > { %624 = vrcp.f32 %v348_v24 }
 0x142   : > { %653 = shalt.err (!%p650_p3)
}
 0x143   : > { %574 = dma.vmem_to_hbm [thread:$0]  (%p791_p5), %s400_s14, 128, %s402_s15, %s370_s0  }
 0x144   : > { %s365_s23 = scalar_lea.sflag [#allocation3], %s819_s16  ;;  %s668_s7 = sshra.s32 %s388_s13, 4  ;;  %s669_s7 = int_to_ptr.hbm [resolvable:$true] %s668_s7 }
 0x145   : > { %s670_s9 = scalar_lea.hbm %s669_s7, 8  ;;  %s674_s22 = scalar_lea.hbm %s876_s4, 24 }
 0x146   : > { %p671_p4 = scmp.ne.s32.totalorder %s669_s7, %s670_s9  ;;  %p675_p9 = scmp.lt.s32.totalorder %s669_s7, %s876_s4 }
 0x147   : > { %v625_v25 = vpop.eup %624  ;;  %p676_p10 = scmp.lt.s32.totalorder %s674_s22, %s670_s9 }
 0x148   : > { %v350_v26 = vmul.f32 %v625_v25, %v346_v23  ;;  %p672_p7 = pnand %p671_p4, %p791_p5 }
 0x149   : > { %p677_p11 = por %p676_p10, %p675_p9 }
 0x14a   : > { %v351_v27 = vmul.f32 %v350_v26, %v338_v19  ;;  %359 = vst [vmem:[%s226_s11] sm:$0xff] %v350_v26  ;;  %p673_p8 = pneg %p672_p7 }
 0x14c   : > { %p678_p12 = pnand %p677_p11, %p673_p8 }
 0x14e   : > { %681 = shalt.err (!%p678_p12)
}
 0x14f   : > { %573 = dma.vmem_to_hbm [thread:$0]  (%p791_p5), %s386_s12, 128, %s388_s13, %s365_s23   ;;  %352 = vadd.xlane.f32.xlu1 %v351_v27  ;;  %vm357_vm1 = vcmask 57344  }
 0x150   : > { %s241_s14 = scalar_lea.vmem %s875_s3, %s803_s30 }
 0x1c2   : > { %v353_v28 = vpop.xlane.xlu1 %352 }
 0x1c3   : > { %v355_v29 = vperm.slane %v353_v28, %v344_v21 }
 0x1c5   : > { %358 = vst.msk [vmem:[%s241_s14] sm:$0x1] %vm357_vm1, %v355_v29 }
 0x1c6 PF: > { %p584_p13 = scmp.ge.s32.totalorder %s720_s21, 2  ;;  %s419_s15 = sand.u32 1, %s708_s18  }
 0x1c7   : > { %s420_s28 = scalar_lea.sflag [#allocation3], %s419_s15 }
 0x1c8   : > { %p578_p0 = pnand %p584_p13, %p795_p6 }
 0x1ca   : > { %p579_p1 = pneg %p578_p0 }
 0x1cc   : > { %699 = dma.done.wait (%p579_p1), %s420_s28, 128  }
 0x1cd   : > { %701 = vsyncadd (%p579_p1), %s420_s28, 4294967168  ;;  %s430_s12 = scalar_lea.sflag [#allocation5], %s419_s15 }
 0x1ce   : > { %703 = dma.done.wait (%p579_p1), %s430_s12, 128  }
 0x1cf   : > { %705 = vsyncadd (%p579_p1), %s430_s12, 4294967168  ;;  %p19_p5 = scmp.ge.s32.totalorder %s778_s24, 5   ;;  %s884_s18 = smov %s712_s19 }
 0x1d0   : > { %s885_s19 = smov %s716_s20  ;;  %s886_s20 = smov %s789_s27 }
 0x1d1   : > { %s887_s21 = smov %s778_s24  ;;  %21 = sbr.rel (!%p19_p5) target bundleno = 8 (0x8), region = 96 }
 0x1d6   :  { %436 = vsyncpa [#allocation3], 1 }
 0x1d7   :  { %438 = vsyncpa [#allocation3 + $0x1], 1 }
 0x1d8   :  { %439 = vsyncpa [#allocation5], 1 }
 0x1d9   :  { %441 = vsyncpa [#allocation5 + $0x1], 1 }

</bundles_post_ra>
